<compile_context>
chip_gen: v7x
topology: tpu7x:2x2x1
jax: 0.10.0
libtpu: 0.0.40
codegen_flags: <defaults>
</compile_context>

<pallas_src>
import functools

import numpy as np
import jax
import jax.numpy as jnp
from jax import lax
from jax.experimental import pallas as pl
from jax.experimental.pallas import tpu as pltpu


# ---------------------------------------------------------------------------
# VMEM budget: ~85% of physical VMEM (v7x: 64 MiB -> ~54 MiB; v5e/v6e: 128 MiB
# -> ~109 MiB).  Guarded so a failed query just falls back to 128 MiB * 0.85.
# ---------------------------------------------------------------------------
def _default_vmem_limit_bytes(frac=0.85):
    cap = None
    try:
        cap = getattr(pltpu.get_tpu_info(), "vmem_capacity_bytes", None)
    except Exception:
        cap = None
    if not cap:
        cap = 128 * 1024 * 1024
    return max(int(cap * frac), 32 * 1024 * 1024)


# ---------------------------------------------------------------------------
# One-time weight re-layout (keep OUT of the per-forward-call path).
# ---------------------------------------------------------------------------
def prepare_attention_weights(W_Q, W_K, W_V, W_O, compute_dtype=jnp.bfloat16):
    H, Dh, D = W_Q.shape
    hd = H * Dh
    wq = jnp.transpose(W_Q, (2, 0, 1)).reshape(D, hd).astype(compute_dtype)   # [D, hd]
    wk = jnp.transpose(W_K, (2, 0, 1)).reshape(D, hd)
    wv = jnp.transpose(W_V, (2, 0, 1)).reshape(D, hd)
    wkv = jnp.concatenate([wk, wv], axis=1).astype(compute_dtype)             # [D, 2*hd]
    wo = W_O.T.astype(compute_dtype)                                          # [hd, D]
    return wq, wkv, wo


# ---------------------------------------------------------------------------
# Hoisted K/V projection: one wide [tp, D] @ [D, 2*H*Dh] matmul per token tile,
# done ONCE (previous version recomputed it once per q-tile inside the flash
# loop).  Output is lane-packed [B, P, 2*H*Dh] in compute_dtype.
# ---------------------------------------------------------------------------
def _kv_proj_kernel(x_ref, wkv_ref, kv_ref):
    kv_ref[...] = jnp.dot(
        x_ref[...], wkv_ref[...], preferred_element_type=jnp.float32
    ).astype(kv_ref.dtype)


def _project_kv(x, wkv, *, block_p, vmem_limit_bytes):
    B, P, D = x.shape
    two_hd = wkv.shape[1]
    tp = min(block_p, P)
    if P % tp:
        raise ValueError("seq length must be divisible by the projection tile")
    return pl.pallas_call(
        _kv_proj_kernel,
        out_shape=jax.ShapeDtypeStruct((B, P, two_hd), wkv.dtype),
        grid_spec=pltpu.PrefetchScalarGridSpec(
            num_scalar_prefetch=0,
            grid=(B, P // tp),
            in_specs=[
                pl.BlockSpec((None, tp, D), lambda b, i: (b, i, 0)),
                pl.BlockSpec((D, two_hd), lambda b, i: (0, 0)),
            ],
            out_specs=pl.BlockSpec((None, tp, two_hd), lambda b, i: (b, i, 0)),
        ),
        compiler_params=pltpu.CompilerParams(
            dimension_semantics=("parallel", "parallel"),
            vmem_limit_bytes=vmem_limit_bytes,
        ),
    )(x, wkv)


# ---------------------------------------------------------------------------
# Flash-attention kernel (consumes precomputed K|V tiles).
# ---------------------------------------------------------------------------
def _flash_attn_kernel(xq_ref, kv_ref, wq_ref, wo_ref, out_ref,
                       q_scr, acc_scr, m_scr, l_scr,
                       *, num_heads, d_head, sm_scale, block_q, block_kv):
    qi = pl.program_id(1)
    ki = pl.program_id(2)
    hd = num_heads * d_head

    q_base = qi * block_q
    k_base = ki * block_kv

    # ---- init (first kv step of this (batch, q-tile)) -----------------------
    @pl.when(ki == 0)
    def _():
        # Fused Q projection for ALL heads: one wide MXU matmul, cached in VMEM
        # and pre-scaled by 1/sqrt(d_head) (instead of scaling scores per step).
        q_all = jnp.dot(xq_ref[...], wq_ref[...],
                        preferred_element_type=jnp.float32)
        q_scr[...] = (q_all * sm_scale).astype(q_scr.dtype)
        m_scr[...] = jnp.full(m_scr.shape, -jnp.inf, jnp.float32)
        l_scr[...] = jnp.zeros(l_scr.shape, jnp.float32)
        acc_scr[...] = jnp.zeros(acc_scr.shape, jnp.float32)

    # ---- online-softmax update ----------------------------------------------
    def update(masked):
        kv_all = kv_ref[...]            # precomputed [tk, 2*H*Dh], compute_dtype
        q_all = q_scr[...]
        if masked:
            # Mask computed once per grid step, shared by all heads.
            row = lax.broadcasted_iota(jnp.int32, (block_q, block_kv), 0) + q_base
            col = lax.broadcasted_iota(jnp.int32, (block_q, block_kv), 1) + k_base
            keep = col <= row
        # Trace-time head loop (H is small here); see TODO above for large H.
        for h in range(num_heads):
            sl = slice(h * d_head, (h + 1) * d_head)
            q_h = q_all[:, sl]                                   # [tq, Dh]
            k_h = kv_all[:, sl]                                  # [tk, Dh]
            v_h = kv_all[:, hd + h * d_head:hd + (h + 1) * d_head]

            # q @ k^T without materializing a transpose (contract last dims).
            s = lax.dot_general(q_h, k_h, (((1,), (1,)), ((), ())),
                                preferred_element_type=jnp.float32)
            if masked:
                s = jnp.where(keep, s, -1e10)

            m_prev = m_scr[h]                                    # [tq, 1]
            m_new = jnp.maximum(m_prev, jnp.max(s, axis=-1, keepdims=True))
            alpha = jnp.exp(m_prev - m_new)
            p = jnp.exp(s - m_new)                               # f32 softmax

            l_scr[h] = alpha * l_scr[h] + jnp.sum(p, axis=-1, keepdims=True)
            acc_scr[:, sl] = alpha * acc_scr[:, sl] + jnp.dot(
                p.astype(v_h.dtype), v_h, preferred_element_type=jnp.float32)
            m_scr[h] = m_new

    # Fast path: kv tile fully below the diagonal -> no mask work at all.
    @pl.when(k_base + block_kv - 1 <= q_base)
    def _():
        update(masked=False)

    # Diagonal-straddling tiles need the causal select; tiles fully above the
    # diagonal fall through both branches (and their DMA was skipped by the
    # clamped index_map).
    @pl.when(jnp.logical_and(k_base + block_kv - 1 > q_base,
                             k_base <= q_base + block_q - 1))
    def _():
        update(masked=True)

    # ---- finalize: normalize + ONE wide, lane-dense output projection -------
    @pl.when(ki == pl.num_programs(2) - 1)
    def _():
        for h in range(num_heads):
            sl = slice(h * d_head, (h + 1) * d_head)
            inv_l = pl.reciprocal(l_scr[h], approx=True)   # EUP slot, ~free
            acc_scr[:, sl] = acc_scr[:, sl] * inv_l
        z_flat = acc_scr[...].astype(wo_ref.dtype)         # [tq, H*Dh]
        out_ref[...] = jnp.dot(z_flat, wo_ref[...],
                               preferred_element_type=jnp.float32
                               ).astype(out_ref.dtype)


# ---------------------------------------------------------------------------
# Wrappers
# ---------------------------------------------------------------------------
def attention_pallas_prepared(x, wq, wkv, wo, *, num_heads, d_head,
                              block_q=256, block_kv=512, proj_block_p=512,
                              compute_dtype=jnp.bfloat16,
                              vmem_limit_bytes=None):
    B, P, D = x.shape
    hd = num_heads * d_head
    out_dtype = x.dtype

    if vmem_limit_bytes is None:
        vmem_limit_bytes = _default_vmem_limit_bytes()

    tq = min(block_q, P)
    tk = min(block_kv, P)
    if P % tq or P % tk:
        raise ValueError("seq length must be divisible by the q/kv tile sizes")

    xc = x.astype(compute_dtype)

    # (1) Hoisted K/V projection: done once per token, not once per q-tile.
    kv = _project_kv(xc, wkv, block_p=proj_block_p,
                     vmem_limit_bytes=vmem_limit_bytes)

    kernel = functools.partial(
        _flash_attn_kernel, num_heads=num_heads, d_head=d_head,
        sm_scale=1.0 / float(np.sqrt(d_head)), block_q=tq, block_kv=tk)

    def kv_index_map(b, qi, ki):
        # Clamp: kv tiles fully above the causal diagonal repeat the previous
        # block index, so Pallas issues no new DMA for skipped steps.
        last_needed = ((qi + 1) * tq - 1) // tk
        return (b, jnp.minimum(ki, last_needed), 0)

    # On v7x keep B * (P // tq) even so both TensorCores get balanced work.
    grid = (B, P // tq, P // tk)

    return pl.pallas_call(
        kernel,
        out_shape=jax.ShapeDtypeStruct((B, P, D), out_dtype),
        grid_spec=pltpu.PrefetchScalarGridSpec(
            num_scalar_prefetch=0,
            grid=grid,
            in_specs=[
                pl.BlockSpec((None, tq, D), lambda b, qi, ki: (b, qi, 0)),   # x (queries)
                pl.BlockSpec((None, tk, 2 * hd), kv_index_map),              # precomputed K|V
                pl.BlockSpec((D, hd), lambda b, qi, ki: (0, 0)),             # W_Q fused
                pl.BlockSpec((hd, D), lambda b, qi, ki: (0, 0)),             # W_O^T
            ],
            out_specs=pl.BlockSpec((None, tq, D), lambda b, qi, ki: (b, qi, 0)),
            scratch_shapes=[
                pltpu.VMEM((tq, hd), compute_dtype),            # scaled q, all heads
                pltpu.VMEM((tq, hd), jnp.float32),              # running z (lane-packed)
                pltpu.VMEM((num_heads, tq, 1), jnp.float32),    # running max, per head
                pltpu.VMEM((num_heads, tq, 1), jnp.float32),    # running denom, per head
            ],
        ),
        compiler_params=pltpu.CompilerParams(
            dimension_semantics=("parallel", "parallel", "arbitrary"),
            vmem_limit_bytes=vmem_limit_bytes,
        ),
    )(xc, kv, wq, wo)


def attention_pallas(x, W_Q, W_K, W_V, W_O, **kwargs):
    """Convenience entry: re-layouts raw PyTorch-style weights then runs the kernel.

    For repeated forward calls, call prepare_attention_weights() once and use
    attention_pallas_prepared() directly (keeps the weight plumbing out of the
    per-call path).
    """
    compute_dtype = kwargs.get("compute_dtype", jnp.bfloat16)
    H, Dh, _ = W_Q.shape
    wq, wkv, wo = prepare_attention_weights(W_Q, W_K, W_V, W_O, compute_dtype)
    return attention_pallas_prepared(x, wq, wkv, wo, num_heads=H, d_head=Dh, **kwargs)


# ---------------------------------------------------------------------------
# Pure-JAX reference (mirrors the PyTorch module's forward)
# ---------------------------------------------------------------------------
def attention_reference(x, W_Q, W_K, W_V, W_O, d_head):
    k = jnp.einsum('ihd,bpd->biph', W_K, x)
    q = jnp.einsum('ihd,bpd->biph', W_Q, x)
    v = jnp.einsum('ihd,bpd->biph', W_V, x)
    scores = jnp.einsum('biph,biqh->biqp', k, q)
    p = x.shape[1]
    mask = jnp.tril(jnp.ones((p, p), dtype=x.dtype))
    masked = jnp.tril(scores) - 1e10 * (1 - mask)
    attn = jax.nn.softmax(masked / np.sqrt(d_head), axis=-1)
    z = jnp.einsum('biph,biqp->biqh', v, attn)
    b = x.shape[0]
    z_flat = z.transpose(0, 2, 1, 3).reshape(b, p, -1)
    return jnp.einsum('df,bqf->bqd', W_O, z_flat)


if __name__ == "__main__":
    # Small, forward-consistent shapes.
    batch, seq = 2, 8
    d_model, num_heads, d_head, n_ctx = 32, 4, 8, 8

    key = jax.random.PRNGKey(0)
    kx, kq, kk, kv, ko = jax.random.split(key, 5)

    x = jax.random.normal(kx, (batch, seq, d_model), dtype=jnp.float32)
    scale = 1.0 / np.sqrt(d_model)
    W_Q = jax.random.normal(kq, (num_heads, d_head, d_model), jnp.float32) * scale
    W_K = jax.random.normal(kk, (num_heads, d_head, d_model), jnp.float32) * scale
    W_V = jax.random.normal(kv, (num_heads, d_head, d_model), jnp.float32) * scale
    W_O = jax.random.normal(ko, (d_model, d_head * num_heads), jnp.float32) * scale

    ref = jax.block_until_ready(attention_reference(x, W_Q, W_K, W_V, W_O, d_head))

    # f32 MXU path: tight check (only deviations: online softmax + approx recip).
    out_f32 = jax.block_until_ready(
        attention_pallas(x, W_Q, W_K, W_V, W_O, compute_dtype=jnp.float32))
    assert out_f32.shape == (batch, seq, d_model)
    np.testing.assert_allclose(np.asarray(out_f32), np.asarray(ref),
                               atol=5e-3, rtol=5e-3)

    # bf16 MXU path (f32 accumulation, f32 softmax): looser check.
    wq_p, wkv_p, wo_p = prepare_attention_weights(W_Q, W_K, W_V, W_O, jnp.bfloat16)
    out_bf16 = jax.block_until_ready(
        attention_pallas_prepared(x, wq_p, wkv_p, wo_p,
                                  num_heads=num_heads, d_head=d_head,
                                  compute_dtype=jnp.bfloat16))
    assert out_bf16.shape == (batch, seq, d_model)
    np.testing.assert_allclose(np.asarray(out_bf16), np.asarray(ref),
                               atol=1e-1, rtol=1e-1)

    print("KERNEL_OK")
</pallas_src>

<mosaic_0001>
module attributes {stable_mosaic.version = 11 : i64} {
  func.func @_kv_proj_kernel(%arg0: i32, %arg1: i32, %arg2: memref<1x8x32xf32, #tpu.memory_space<vmem>>, %arg3: memref<32x64xf32, #tpu.memory_space<vmem>>, %arg4: memref<1x8x64xf32, #tpu.memory_space<vmem>>) attributes {dimension_semantics = [#tpu.dimension_semantics<parallel>, #tpu.dimension_semantics<parallel>], iteration_bounds = array<i64: 2, 1>, scalar_prefetch = 0 : i64, scratch_operands = 0 : i64, tpu.core_type = #tpu.core_type<tc>, window_params = [{transform_indices = @transform_0, window_bounds = array<i64: 1, 8, 32>}, {pipeline_mode = #tpu.pipeline_mode<synchronous>, transform_indices = @transform_1, window_bounds = array<i64: 32, 64>}, {transform_indices = @transform_2, window_bounds = array<i64: 1, 8, 64>}]} {
    %c0 = arith.constant 0 : index
    %c0_0 = arith.constant 0 : index
    %c0_1 = arith.constant 0 : index
    %0 = vector.load %arg2[%c0, %c0_0, %c0_1] : memref<1x8x32xf32, #tpu.memory_space<vmem>>, vector<1x8x32xf32>
    %1 = vector.shape_cast %0 : vector<1x8x32xf32> to vector<8x32xf32>
    %c0_2 = arith.constant 0 : index
    %c0_3 = arith.constant 0 : index
    %2 = vector.load %arg3[%c0_2, %c0_3] : memref<32x64xf32, #tpu.memory_space<vmem>>, vector<32x64xf32>
    %cst = arith.constant dense<0.000000e+00> : vector<8x64xf32>
    %3 = tpu.matmul %1, %2, %cst {dimension_numbers = #tpu.dot_dimension_numbers<[1], [0], [0], [1], [0, 0, 1, 1], [], []>} : vector<8x32xf32>, vector<32x64xf32>, vector<8x64xf32> -> vector<8x64xf32>
    %c0_4 = arith.constant 0 : index
    %c0_5 = arith.constant 0 : index
    %c0_6 = arith.constant 0 : index
    %4 = vector.load %arg4[%c0_4, %c0_5, %c0_6] : memref<1x8x64xf32, #tpu.memory_space<vmem>>, vector<1x8x64xf32>
    %5 = vector.shape_cast %4 : vector<1x8x64xf32> to vector<8x64xf32>
    %6 = vector.shape_cast %3 : vector<8x64xf32> to vector<1x8x64xf32>
    tpu.vector_store %arg4[%c0_4, %c0_5, %c0_6], %6 {strides = array<i32>} : memref<1x8x64xf32, #tpu.memory_space<vmem>>, vector<1x8x64xf32>,
    return
  }
  func.func @transform_0(%arg0: i32, %arg1: i32) -> (i32, i32, i32) {
    %c0_i32 = arith.constant 0 : i32
    %c0_i32_0 = arith.constant 0 : i32
    return %arg0, %arg1, %c0_i32 : i32, i32, i32
  }
  func.func @transform_1(%arg0: i32, %arg1: i32) -> (i32, i32) {
    %c0_i32 = arith.constant 0 : i32
    %c0_i32_0 = arith.constant 0 : i32
    %c0_i32_1 = arith.constant 0 : i32
    return %c0_i32, %c0_i32_0 : i32, i32
  }
  func.func @transform_2(%arg0: i32, %arg1: i32) -> (i32, i32, i32) {
    %c0_i32 = arith.constant 0 : i32
    %c0_i32_0 = arith.constant 0 : i32
    return %arg0, %arg1, %c0_i32 : i32, i32, i32
  }
}

</mosaic_0001>

<bundles_post_ra>
// kernel: tpu_custom_call.1
= control target key start
LH: loop header
LB: loop body
LE: loop exit
PB: predicated region body
PF: predicated region fallthrough
CT: control target
= control target key end

     0   :  { %7 = vsyncpa [#allocation3], 0  ;;  %s876_s0 = inlined_call_operand.hbm [shape: f32[2,8,32], index: 0, kind: input, shape index: {}]   ;;  %s877_s1 = inlined_call_operand.hbm [shape: f32[32,64], index: 1, kind: input, shape index: {}]   ;;  %s878_s2 = inlined_call_operand.hbm [shape: f32[2,8,64], index: 2, kind: output, shape index: {}]  }
   0x1   :  { %9 = vsyncpa [#allocation3 + $0x1], 0 }
   0x2   :  { %10 = vsyncpa [#allocation6], 0 }
   0x3   :  { %11 = vsyncpa [#allocation4], 0 }
   0x4   :  { %13 = vsyncpa [#allocation4 + $0x1], 0  ;;  %s662_s9 = smov 0   ;;  %s664_s10 = smov 0  }
   0x5   :  { %s666_s11 = smov 0   ;;  %s668_s12 = smov 0  }
   0x6   :  { %s670_s13 = smov 0   ;;  %s672_s14 = smov 0  }
   0x7 LB: > { %s377_s15 = sadd.s32 4294967295, %s637_s14   ;;  %s378_s16 = sadd.s32 4294967294, %s637_s14   ;;  %s637_s14 = sphi %s672_s14, %s19_s14   ;;  %s633_s13 = sphi %s670_s13, %s902_s13   ;;  %s629_s12 = sphi %s668_s12, %s901_s12   ;;  %s625_s11 = sphi %s666_s11, %s900_s11   ;;  %s621_s10 = sphi %s664_s10, %s899_s10   ;;  %s617_s9 = sphi %s662_s9, %s898_s9  }
   0x8   : > { %p53_p0 = scmp.ne.s32.totalorder %s621_s10, %s617_s9  ;;  %p696_p1 = scmp.eq.s32.totalorder %s377_s15, 0 }
   0x9   : > { %p700_p2 = scmp.eq.s32.totalorder %s377_s15, 1  ;;  %p106_p3 = scmp.eq.s32.totalorder %s378_s16, 1 }
   0xa   : > { %s883_s17 = scalar_select %p696_p1, 1, 0 }
   0xb   : > { %s884_s18 = scalar_select %p700_p2, 1, 0 }
   0xc   : > { %p706_p4 = por %p696_p1, %p53_p0  ;;  %p379_p5 = scmp.ge.s32.totalorder %s637_s14, 1 }
   0xd   : > { %p711_p6 = por %p106_p3, %p53_p0  ;;  %p113_p7 = scmp.lt.s32.totalorder %s637_s14, 3 }
   0xe   : > { %s885_s19 = scalar_select %p706_p4, 1, 0 }
   0xf   : > { %s886_s20 = scalar_select %p711_p6, 1, 0 }
  0x10   : > { %p716_p8 = pnand %p379_p5, %p113_p7  ;;  %s639_s22 = smov [#allocation5]  }
  0x11   : > { %s125_s23 = sshll.u32 %s639_s22, 4  ;;  %s31_s25 = sadd.s32 1, %s633_s13  ;;  %s126_s23 = int_to_ptr.vmem [resolvable:$true] %s125_s23 }
  0x12   : > { %s887_s21 = scalar_select %p716_p8, 1, 0 }
  0x13   : > { %p423_p9 = pneg %p716_p8  ;;  %s493_s28 = scalar_lea.hbm %s877_s1, 512 }
  0x14   : > { %p494_p12 = scmp.ne.s32.totalorder %s877_s1, %s493_s28  ;;  %p500_p5 = scmp.lt.u32.totalorder %s493_s28, %s877_s1 }
  0x15   : > { %p725_p11 = pnand %p423_p9, %p696_p1 }
  0x17   : > { %p495_p13 = pneg %p725_p11 }
  0x19   : > { %p496_p0 = pnand %p495_p13, %p494_p12 }
  0x1b   : > { %p497_p3 = pneg %p496_p0 }
  0x1d   : > { %p502_p7 = pnand %p500_p5, %p497_p3 }
  0x1f   : > { %505 = shalt.err (!%p502_p7)
}
  0x20   : > { %s506_s5 = scalar_lea.vmem %s126_s23, 512  ;;  %p514_p1 = scmp.lt.s32.totalorder %s126_s23, %s126_s23 }
  0x21   : > { %p507_p9 = scmp.ne.s32.totalorder %s126_s23, %s506_s5  ;;  %p515_p4 = scmp.lt.s32.totalorder %s506_s5, %s506_s5 }
  0x23   : > { %p509_p10 = pnand %p507_p9, %p495_p13  ;;  %p516_p8 = por %p515_p4, %p514_p1 }
  0x25   : > { %p510_p6 = pneg %p509_p10 }
  0x27   : > { %p517_p2 = pnand %p516_p8, %p510_p6 }
  0x29   : > { %520 = shalt.err (!%p517_p2)
}
  0x2a   : > { %s640_s6 = smov 128   ;;  %s641_s7 = smov 8  }
  0x2b   : > { %426 = dma.hbm_to_vmem [thread:$0]  (!%p725_p11), %s877_s1, 512, %s126_s23, [#allocation6], %s640_s6, %s640_s6, %s641_s7  }
  0x2c   : > { %p33_p1 = scmp.ge.s32.totalorder %s31_s25, 2  ;;  %s40_s16 = sadd.s32 1, %s625_s11 }
  0x2d   : > { %p47_p2 = scmp.ne.s32.totalorder %s625_s11, %s621_s10  ;;  %p48_p4 = scmp.eq.s32.totalorder %s637_s14, 0 }
  0x2e   : > { %s904_s25 = smov (%p33_p1, %s31_s25), 0  ;;  %p890_p8 = scmp.ne.s32.totalorder %s884_s18, 0 }
  0x2f   : > { %p752_p6 = por %p48_p4, %p47_p2  ;;  %s35_s24 = ssub.s32 %s633_s13, %s904_s25 }
  0x30   : > { %p758_p10 = por %p890_p8, %p47_p2  ;;  %p436_p12 = scmp.lt.s32.totalorder %s637_s14, 2 }
  0x31   : > { %p38_p11 = scmp.eq.s32.totalorder %s35_s24, 0  ;;  %s139_s23 = sand.u32 1, %s625_s11  }
  0x32   : > { %s382_s27 = sshll.u32 %s139_s23, 3  ;;  %s383_s29 = sshll.u32 %s633_s13, 7 }
  0x33   : > { %s767_s28 = scalar_select %p38_p11, %s625_s11, %s40_s16  }
  0x34   : > { %s773_s4 = scalar_lea.hbm %s876_s0, %s383_s29  ;;  %s143_s18 = scalar_lea.vmem [#allocation2], %s382_s27 }
  0x35   : > { %s151_s5 = sshll.u32 %s143_s18, 4  ;;  %p779_p13 = pnand %p436_p12, %p752_p6  ;;  %s775_s5 = int_to_ptr.vmem [resolvable:$true] %s151_s5 }
  0x36   : > { %s140_s7 = scalar_lea.sflag [#allocation3], %s139_s23  ;;  %s521_s8 = scalar_lea.hbm %s773_s4, 128 }
  0x37   : > { %p522_p0 = scmp.ne.s32.totalorder %s773_s4, %s521_s8  ;;  %p523_p3 = pneg %p779_p13 }
  0x38   : > { %s526_s24 = scalar_lea.hbm %s876_s0, 256  ;;  %p527_p9 = scmp.lt.u32.totalorder %s773_s4, %s876_s0 }
  0x39   : > { %p524_p5 = pnand %p523_p3, %p522_p0  ;;  %p528_p1 = scmp.lt.u32.totalorder %s526_s24, %s521_s8 }
  0x3a   : > { %p530_p4 = scmp.lt.u32.totalorder %s521_s8, %s773_s4 }
  0x3b   : > { %p525_p7 = pneg %p524_p5  ;;  %p529_p2 = por %p528_p1, %p527_p9 }
  0x3d   : > { %p531_p6 = por %p530_p4, %p529_p2 }
  0x3f   : > { %p532_p8 = pnand %p531_p6, %p525_p7 }
  0x41   : > { %535 = shalt.err (!%p532_p8)
}
  0x42   : > { %s536_s23 = scalar_lea.vmem %s775_s5, 128  ;;  %s642_s29 = smov [#allocation2]  }
  0x43   : > { %p537_p12 = scmp.ne.s32.totalorder %s775_s5, %s536_s23  ;;  %s541_s30 = sshll.u32 %s642_s29, 4  ;;  %s542_s30 = int_to_ptr.vmem [resolvable:$false] %s541_s30 }
  0x44   : > { %s543_s3 = scalar_lea.vmem %s542_s30, 256  ;;  %p544_p5 = scmp.lt.s32.totalorder %s775_s5, %s542_s30 }
  0x45   : > { %p539_p11 = pnand %p537_p12, %p523_p3  ;;  %p545_p9 = scmp.lt.s32.totalorder %s543_s3, %s536_s23 }
  0x47   : > { %p540_p0 = pneg %p539_p11  ;;  %p546_p1 = por %p545_p9, %p544_p5 }
  0x49   : > { %p547_p2 = pnand %p546_p1, %p540_p0 }
  0x4b   : > { %550 = shalt.err (!%p547_p2)
}
  0x4c   : > { %430 = dma.hbm_to_vmem [thread:$0]  (!%p779_p13), %s773_s4, 128, %s775_s5, %s140_s7  }
  0x4d   : > { %p893_p7 = scmp.ne.s32.totalorder %s887_s21, 0 }
  0x4e   : > { %s811_s18 = sand.u32 (!%p893_p7), 1, %s621_s10   ;;  %p894_p3 = scmp.ne.s32.totalorder (!%p893_p7), %s885_s19, 0 }
  0x4f   : > { %160 = sbr.rel (%p893_p7) target bundleno = 327 (0x147), region = 28  ;;  %s385_s8 = sshll.u32 (!%p893_p7), %s811_s18, 3 }
  0x50   : > { %s163_s15 = scalar_lea.sflag (!%p893_p7), [#allocation3], %s811_s18  ;;  %s166_s16 = scalar_lea.vmem (!%p893_p7), [#allocation2], %s385_s8 }
  0x56   : > { %604 = dma.done.wait (%p894_p3), %s163_s15, 128  }
  0x57   : > { %606 = vsyncadd (%p894_p3), %s163_s15, 4294967168  ;;  %p895_p4 = scmp.ne.s32.totalorder %s883_s17, 0 }
  0x59   : > { %608 = dma.done.wait (%p895_p4), [#allocation6], 512  }
  0x5a   : > { %610 = vsyncadd (%p895_p4), [#allocation6], 4294966784  ;;  %v643_v0 = vmov 0.0|0.0   ;;  %vm644_vm0 = vmmov 0   ;;  %v645_v1 = vmov 0.0   ;;  %v192_v2 = vld [vmem:[#allocation5] sm:$0xff] }
  0x5b   : > { %409 = vmatprep.subr.bf16.mxu0 %v643_v0  ;;  %406 = vmatprep.mubr.msk.f32.mxu0 %vm644_vm0, %v645_v1  ;;  %v193_v3 = vld [vmem:[#allocation5 + $0x8] sm:$0xff]  ;;  %v194_v4 = vld [vmem:[#allocation5 + $0x10] sm:$0xff]  ;;  %v195_v6 = vld [vmem:[#allocation5 + $0x18] sm:$0xff]  ;;  %vm196_vm1 = vcmask 261120   ;;  %s390_s17 = sshll.u32 %s629_s12, 7  ;;  %s190_s19 = scalar_lea.vmem [#allocation7], %s385_s8 }
  0x5c   : > { %v410_v5 = vpack.c.bf16 %v193_v3, %v192_v2  ;;  %v413_v7 = vpack.c.bf16 %v195_v6, %v194_v4  ;;  %v191_v8 = vld [vmem:[%s166_s16] sm:$0xff]  ;;  %s287_s21 = sshll.u32 %s190_s19, 4  ;;  %vm270_vm2 = vcmask 523264   ;;  %s827_s6 = scalar_lea.hbm %s878_s2, %s390_s17  ;;  %s829_s21 = int_to_ptr.vmem [resolvable:$true] %s287_s21 }
  0x5d   : > { %s273_s7 = scalar_lea.sflag [#allocation4], %s811_s18  ;;  %s551_s24 = scalar_lea.vmem %s829_s21, 128 }
  0x5e   : > { %411 = vmatpush3.bf16.msra.mxu0 %v410_v5  ;;  %p552_p13 = scmp.ne.s32.totalorder %s829_s21, %s551_s24  ;;  %s646_s12 = smov [#allocation7]  }
  0x5f   : > { %412 = vmatprep.subr.bf16.mxu0 %v643_v0  ;;  %s555_s22 = sshll.u32 %s646_s12, 4  ;;  %s556_s22 = int_to_ptr.vmem [resolvable:$false] %s555_s22 }
  0x60   : > { %p553_p6 = pnand %p552_p13, %p758_p10  ;;  %s557_s27 = scalar_lea.vmem %s556_s22, 256 }
  0x61   : > { %p558_p12 = scmp.lt.s32.totalorder %s829_s21, %s556_s22  ;;  %p559_p11 = scmp.lt.s32.totalorder %s557_s27, %s551_s24 }
  0x62   : > { %414 = vmatpush3.bf16.msra.mxu0 %v413_v7  ;;  %p554_p8 = pneg %p553_p6 }
  0x63   : > { %p560_p0 = por %p559_p11, %p558_p12 }
  0x65   : > { %407 = vmatmul.mubr.msk.f32.vlgmr.msra.gmra.mrb[0].mxu0 %vm196_vm1, %v191_v8  ;;  %p561_p5 = pnand %p560_p0, %p554_p8 }
 0x138   : > { %v266_v9 = vpop.f32.mrb[0].mxu0 }
 0x139   : > { %271 = vst.msk [vmem:[%s190_s19] sm:$0xff] %vm270_vm2, %v266_v9  ;;  %v408_v10 = vpop.f32.mrb[1].mxu0 }
 0x13a   : > { %564 = shalt.err (!%p561_p5)
}
 0x13b   : > { %s565_s23 = scalar_lea.hbm %s827_s6, 128  ;;  %s569_s3 = scalar_lea.hbm %s878_s2, 256 }
 0x13c   : > { %p566_p9 = scmp.ne.s32.totalorder %s827_s6, %s565_s23  ;;  %p570_p7 = scmp.lt.u32.totalorder %s827_s6, %s878_s2 }
 0x13d   : > { %p571_p3 = scmp.lt.u32.totalorder %s569_s3, %s565_s23  ;;  %p573_p13 = scmp.lt.u32.totalorder %s565_s23, %s827_s6 }
 0x13e   : > { %p567_p1 = pnand %p566_p9, %p758_p10 }
 0x13f   : > { %p572_p4 = por %p571_p3, %p570_p7 }
 0x140   : > { %p568_p2 = pneg %p567_p1 }
 0x141   : > { %p574_p6 = por %p573_p13, %p572_p4 }
 0x143   : > { %p575_p8 = pnand %p574_p6, %p568_p2 }
 0x145   : > { %578 = shalt.err (!%p575_p8)
}
 0x146   : > { %421 = dma.vmem_to_hbm [thread:$0]  (%p758_p10), %s829_s21, 128, %s827_s6, %s273_s7  }
 0x147 PF: > { %s299_s15 = sand.u32 1, %s617_s9   ;;  %p896_p12 = scmp.ne.s32.totalorder %s886_s20, 0 }
 0x148   : > { %p897_p11 = scmp.ge.s32.totalorder %s637_s14, 2  ;;  %s300_s16 = scalar_lea.sflag [#allocation4], %s299_s15 }
 0x14a   : > { %p432_p0 = pnand %p897_p11, %p896_p12 }
 0x14c   : > { %612 = dma.done.wait (!%p432_p0), %s300_s16, 128  }
 0x14d   : > { %614 = vsyncadd (!%p432_p0), %s300_s16, 4294967168  ;;  %s19_s14 = sadd.s32 1, %s637_s14   ;;  %s898_s9 = smov %s621_s10 }
 0x14e   : > { %p16_p5 = scmp.ge.s32.totalorder %s19_s14, 4   ;;  %s899_s10 = smov %s625_s11 }
 0x14f   : > { %s900_s11 = smov %s767_s28  ;;  %s901_s12 = smov %s633_s13 }
 0x150   : > { %s902_s13 = smov %s904_s25  ;;  %18 = sbr.rel (!%p16_p5) target bundleno = 7 (0x7), region = 77 }
 0x157   :  { %305 = vsyncpa [#allocation3], 1 }
 0x158   :  { %307 = vsyncpa [#allocation3 + $0x1], 1 }
 0x159   :  { %308 = vsyncpa [#allocation6], 1 }
 0x15a   :  { %309 = vsyncpa [#allocation4], 1 }
 0x15b   :  { %311 = vsyncpa [#allocation4 + $0x1], 1 }

</bundles_post_ra>
